<compile_context>
chip_gen: v7x
topology: tpu7x:2x2x1
jax: 0.10.0
libtpu: 0.0.40
codegen_flags: <defaults>
</compile_context>

<pallas_src>
import functools

import jax
import jax.numpy as jnp
from jax.experimental import pallas as pl
from jax.experimental.pallas import tpu as pltpu


def _mae_kernel(pred_ref, labels_ref, out_ref, acc_ref, *, batch, block_rows):
    i = pl.program_id(0)

    @pl.when(i == 0)
    def _init():
        acc_ref[0, 0] = jnp.float32(0.0)

    pred = pred_ref[...].astype(jnp.float32)          # (TB, C)
    lbl = labels_ref[...]                             # (TB, 1) int32

    # one-hot selection via iota compare (no gather needed on TPU)
    col = jax.lax.broadcasted_iota(jnp.int32, pred.shape, 1)
    one_hot = (col == lbl).astype(jnp.float32)        # (TB, C)

    # p_true = softmax(pred)[label], numerically stable; only EUP op is exp.
    m = jnp.max(pred, axis=-1, keepdims=True)         # XLU cross-lane reduce
    e = jnp.exp(pred - m)                             # EUP
    denom = jnp.sum(e, axis=-1, keepdims=True)        # (TB, 1)
    num = jnp.sum(one_hot * e, axis=-1, keepdims=True)
    p_true = num / denom                              # (TB, 1)

    # mask batch-padding rows
    row = jax.lax.broadcasted_iota(jnp.int32, p_true.shape, 0) + i * block_rows
    valid = (row < batch).astype(jnp.float32)

    tile_sum = jnp.sum(valid * (1.0 - p_true))
    acc_ref[0, 0] = acc_ref[0, 0] + tile_sum

    @pl.when(i == pl.num_programs(0) - 1)
    def _finalize():
        out_ref[0, 0] = acc_ref[0, 0] * (1.0 / batch)


def mae_loss(pred, labels, *, num_classes, block_rows=None):
    """MAE classification loss. pred: (B, C) float, labels: (B,) int."""
    B, C = pred.shape
    assert C == num_classes
    labels2d = labels.astype(jnp.int32).reshape(B, 1)

    if block_rows is None:
        # ~4 MiB of pred per buffer (x2 for double buffering) -> safe on
        # v7x's 64 MiB VMEM, while big enough to amortize per-step overhead.
        tb = max(8, (4 * 1024 * 1024) // (C * 4))
        tb = max(8, (tb // 8) * 8)
        block_rows = min(B, tb)
    block_rows = min(block_rows, B)

    if block_rows == B:
        padded_b = B
    else:
        block_rows = max(8, (block_rows // 8) * 8)
        padded_b = pl.cdiv(B, block_rows) * block_rows

    if padded_b != B:
        pad = padded_b - B
        pred = jnp.pad(pred, ((0, pad), (0, 0)))
        labels2d = jnp.pad(labels2d, ((0, pad), (0, 0)))

    grid = (padded_b // block_rows,)

    kernel = functools.partial(_mae_kernel, batch=B, block_rows=block_rows)

    out = pl.pallas_call(
        kernel,
        out_shape=jax.ShapeDtypeStruct((1, 1), jnp.float32),
        grid_spec=pltpu.PrefetchScalarGridSpec(
            num_scalar_prefetch=0,
            grid=grid,
            in_specs=[
                pl.BlockSpec((block_rows, C), lambda i: (i, 0)),
                pl.BlockSpec((block_rows, 1), lambda i: (i, 0)),
            ],
            out_specs=pl.BlockSpec(memory_space=pltpu.SMEM),
            scratch_shapes=[pltpu.SMEM((1, 1), jnp.float32)],
        ),
        compiler_params=pltpu.CompilerParams(
            dimension_semantics=("arbitrary",),
        ),
    )(pred, labels2d)
    return out[0, 0]


def _mae_ref(pred, labels, num_classes):
    """Pure-JAX reference mirroring the PyTorch module."""
    p = jax.nn.softmax(pred.astype(jnp.float32), axis=1)
    oh = jax.nn.one_hot(labels, num_classes, dtype=jnp.float32)
    return jnp.mean(1.0 - jnp.sum(oh * p, axis=1))


if __name__ == "__main__":
    num_classes = 10
    batch = 20  # not a multiple of the row tile -> exercises padding + masking

    key = jax.random.PRNGKey(0)
    kp, kl = jax.random.split(key)
    pred = jax.random.normal(kp, (batch, num_classes), dtype=jnp.float32) * 3.0
    labels = jax.random.randint(kl, (batch,), 0, num_classes, dtype=jnp.int32)

    # block_rows=8 -> 3 grid steps, so the pipelined/accumulator path is tested.
    loss = mae_loss(pred, labels, num_classes=num_classes, block_rows=8)
    loss = jax.block_until_ready(loss)

    ref = _mae_ref(pred, labels, num_classes)
    assert jnp.allclose(loss, ref, rtol=1e-5, atol=1e-6), (loss, ref)

    print("KERNEL_OK")
</pallas_src>

<mosaic_0001>
module attributes {stable_mosaic.version = 11 : i64} {
  func.func @_mae_kernel(%arg0: i32, %arg1: memref<8x10xf32, #tpu.memory_space<vmem>>, %arg2: memref<8x1xi32, #tpu.memory_space<vmem>>, %arg3: memref<1x1xf32, #tpu.memory_space<smem>>, %arg4: memref<1x1xf32, #tpu.memory_space<smem>>) attributes {dimension_semantics = [#tpu.dimension_semantics<arbitrary>], iteration_bounds = array<i64: 3>, scalar_prefetch = 0 : i64, scratch_operands = 1 : i64, tpu.core_type = #tpu.core_type<tc>, window_params = [{transform_indices = @transform_0, window_bounds = array<i64: 8, 10>}, {transform_indices = @transform_1, window_bounds = array<i64: 8, 1>}, {transform_indices = @transform_2, window_bounds = array<i64: 1, 1>}]} {
    %c0_i32 = arith.constant 0 : i32
    %0 = arith.cmpi eq, %arg0, %c0_i32 : i32
    %1 = arith.extui %0 : i1 to i32
    %c0_i32_0 = arith.constant 0 : i32
    %2 = arith.cmpi ne, %1, %c0_i32_0 : i32
    scf.if %2 {
      %cst_13 = arith.constant 0.000000e+00 : f32
      %c0_14 = arith.constant 0 : index
      %c0_15 = arith.constant 0 : index
      %42 = memref.load %arg4[%c0_14, %c0_15] : memref<1x1xf32, #tpu.memory_space<smem>>
      memref.store %cst_13, %arg4[%c0_14, %c0_15] : memref<1x1xf32, #tpu.memory_space<smem>>
    } else {
    }
    %c0 = arith.constant 0 : index
    %c0_1 = arith.constant 0 : index
    %3 = vector.load %arg1[%c0, %c0_1] : memref<8x10xf32, #tpu.memory_space<vmem>>, vector<8x10xf32>
    %c0_2 = arith.constant 0 : index
    %c0_3 = arith.constant 0 : index
    %4 = vector.load %arg2[%c0_2, %c0_3] : memref<8x1xi32, #tpu.memory_space<vmem>>, vector<8x1xi32>
    %5 = tpu.iota {dimensions = array<i32: 1>} : vector<8x10xi32>
    %6 = vector.broadcast %4 : vector<8x1xi32> to vector<8x10xi32>
    %7 = arith.cmpi eq, %5, %6 : vector<8x10xi32>
    %8 = arith.extui %7 : vector<8x10xi1> to vector<8x10xi32>
    %9 = arith.sitofp %8 : vector<8x10xi32> to vector<8x10xf32>
    %cst = arith.constant dense<0xFF800000> : vector<8xf32>
    %10 = vector.multi_reduction <maximumf>, %3, %cst [1] : vector<8x10xf32> to vector<8xf32>
    %11 = vector.shape_cast %10 : vector<8xf32> to vector<8x1xf32>
    %12 = vector.broadcast %11 : vector<8x1xf32> to vector<8x10xf32>
    %13 = arith.subf %3, %12 : vector<8x10xf32>
    %14 = math.exp %13 : vector<8x10xf32>
    %cst_4 = arith.constant dense<0.000000e+00> : vector<8xf32>
    %15 = vector.multi_reduction <add>, %14, %cst_4 [1] : vector<8x10xf32> to vector<8xf32>
    %16 = vector.shape_cast %15 : vector<8xf32> to vector<8x1xf32>
    %17 = arith.mulf %9, %14 : vector<8x10xf32>
    %cst_5 = arith.constant dense<0.000000e+00> : vector<8xf32>
    %18 = vector.multi_reduction <add>, %17, %cst_5 [1] : vector<8x10xf32> to vector<8xf32>
    %19 = vector.shape_cast %18 : vector<8xf32> to vector<8x1xf32>
    %20 = arith.divf %19, %16 : vector<8x1xf32>
    %21 = tpu.iota {dimensions = array<i32: 0>} : vector<8x1xi32>
    %c8_i32 = arith.constant 8 : i32
    %22 = arith.muli %arg0, %c8_i32 : i32
    %23 = vector.broadcast %22 : i32 to vector<8x1xi32>
    %24 = arith.addi %21, %23 : vector<8x1xi32>
    %c20_i32 = arith.constant 20 : i32
    %25 = vector.broadcast %c20_i32 : i32 to vector<8x1xi32>
    %26 = arith.cmpi slt, %24, %25 : vector<8x1xi32>
    %27 = arith.extui %26 : vector<8x1xi1> to vector<8x1xi32>
    %28 = arith.sitofp %27 : vector<8x1xi32> to vector<8x1xf32>
    %cst_6 = arith.constant 1.000000e+00 : f32
    %29 = vector.broadcast %cst_6 : f32 to vector<8x1xf32>
    %30 = arith.subf %29, %20 : vector<8x1xf32>
    %31 = arith.mulf %28, %30 : vector<8x1xf32>
    %32 = vector.shape_cast %31 : vector<8x1xf32> to vector<1x8x1xf32>
    %cst_7 = arith.constant dense<0.000000e+00> : vector<1xf32>
    %33 = vector.multi_reduction <add>, %32, %cst_7 [1, 2] : vector<1x8x1xf32> to vector<1xf32>
    %34 = vector.shape_cast %33 : vector<1xf32> to vector<1x1x1xf32>
    %35 = vector.extract %34[0, 0, 0] : f32 from vector<1x1x1xf32>
    %c0_8 = arith.constant 0 : index
    %c0_9 = arith.constant 0 : index
    %36 = memref.load %arg4[%c0_8, %c0_9] : memref<1x1xf32, #tpu.memory_space<smem>>
    %37 = arith.addf %36, %35 : f32
    %c0_10 = arith.constant 0 : index
    %c0_11 = arith.constant 0 : index
    %38 = memref.load %arg4[%c0_10, %c0_11] : memref<1x1xf32, #tpu.memory_space<smem>>
    memref.store %37, %arg4[%c0_10, %c0_11] : memref<1x1xf32, #tpu.memory_space<smem>>
    %c2_i32 = arith.constant 2 : i32
    %39 = arith.cmpi eq, %arg0, %c2_i32 : i32
    %40 = arith.extui %39 : i1 to i32
    %c0_i32_12 = arith.constant 0 : i32
    %41 = arith.cmpi ne, %40, %c0_i32_12 : i32
    scf.if %41 {
      %c0_13 = arith.constant 0 : index
      %c0_14 = arith.constant 0 : index
      %42 = memref.load %arg4[%c0_13, %c0_14] : memref<1x1xf32, #tpu.memory_space<smem>>
      %cst_15 = arith.constant 5.000000e-02 : f32
      %43 = arith.mulf %42, %cst_15 : f32
      %c0_16 = arith.constant 0 : index
      %c0_17 = arith.constant 0 : index
      %44 = memref.load %arg3[%c0_16, %c0_17] : memref<1x1xf32, #tpu.memory_space<smem>>
      memref.store %43, %arg3[%c0_16, %c0_17] : memref<1x1xf32, #tpu.memory_space<smem>>
    } else {
    }
    return
  }
  func.func @transform_0(%arg0: i32) -> (i32, i32) {
    %c0_i32 = arith.constant 0 : i32
    %c0_i32_0 = arith.constant 0 : i32
    return %arg0, %c0_i32 : i32, i32
  }
  func.func @transform_1(%arg0: i32) -> (i32, i32) {
    %c0_i32 = arith.constant 0 : i32
    %c0_i32_0 = arith.constant 0 : i32
    return %arg0, %c0_i32 : i32, i32
  }
  func.func @transform_2(%arg0: i32) -> (i32, i32) {
    %c0_i32 = arith.constant 0 : i32
    %c0_i32_0 = arith.constant 0 : i32
    %c0_i32_1 = arith.constant 0 : i32
    return %c0_i32, %c0_i32_0 : i32, i32
  }
}

</mosaic_0001>

<bundles_post_ra>
// kernel: tpu_custom_call.1
= control target key start
LH: loop header
LB: loop body
LE: loop exit
PB: predicated region body
PF: predicated region fallthrough
CT: control target
= control target key end

     0   :  { %7 = vsyncpa [#allocation4], 0  ;;  %s355_s9 = smov 0   ;;  %s404_s0 = inlined_call_operand.vmem [shape: f32[24,10], index: 0, kind: input, shape index: {}]   ;;  %s405_s1 = inlined_call_operand.vmem [shape: s32[24,1], index: 1, kind: input, shape index: {}]   ;;  %s406_s2 = inlined_call_operand.hbm [shape: f32[1,1], index: 2, kind: output, shape index: {}]  }
   0x1 LB: > { %s361_s10 = sadd.s32 4294967295, %s334_s9   ;;  %p269_p0 = scmp.ge.s32.totalorder %s334_s9, 1  ;;  %s334_s9 = sphi %s355_s9, %s13_s9  }
   0x2   : > { %p116_p1 = scmp.lt.s32.totalorder %s334_s9, 4 }
   0x4   : > { %p117_p2 = pnand %p269_p0, %p116_p1 }
   0x5   : > { %p136_p3 = scmp.lt.s32.totalorder (!%p117_p2), %s361_s10, 2  ;;  %v336_v0 = vmov (!%p117_p2), 0   ;;  %vm160_vm0 = vcmask (!%p117_p2), 80896   ;;  %v152_v6 = vlaneseq (!%p117_p2)  ;;  %v337_v10 = vmov (!%p117_p2), 0.0   ;;  %s274_s19 = sshll.u32 (!%p117_p2), %s361_s10, 3 }
   0x6   : > { %120 = sbr.rel (%p117_p2) target bundleno = 552 (0x228), region = 28  ;;  %307 = vset.pattern.permute.xlu0 (!%p117_p2), %v336_v0  ;;  %v179_v17 = vstv (!%p117_p2), %s274_s19  ;;  %vm186_vm3 = vcmask (!%p117_p2), 7168   ;;  %p291_p4 = scmp.eq.s32.totalorder (!%p117_p2), %s361_s10, 0 }
   0x7   : > { %v153_v8 = vand.u32 (!%p117_p2), 127, %v152_v6  ;;  %v177_v16 = vshrl.u32 (!%p117_p2), %v152_v6, 7  ;;  %s338_s20 = smov (!%p117_p2), 0.0   ;;  %p292_p5 = scmp.eq.s32.totalorder (!%p117_p2), %s361_s10, 2 }
   0x8   : > { %s312_s27 = scalar_lea.hbm (!%p117_p2), %s406_s2, 16 }
   0x9   : > { %v180_v18 = vadd.s32 (!%p117_p2), %v179_v17, %v177_v16  ;;  %p313_p6 = scmp.ne.s32.totalorder (!%p117_p2), %s406_s2, %s312_s27  ;;  %p318_p9 = scmp.lt.u32.totalorder (!%p117_p2), %s312_s27, %s406_s2 }
   0xb   : > { %vm181_vm2 = vcmp.lt.s32.totalorder (!%p117_p2), %v180_v18, 20  ;;  %p314_p7 = pnand (!%p117_p2), %p313_p6, %p292_p5 }
   0xc   : > { %v275_v19 = vsel (!%p117_p2), %vm181_vm2, 1.0, %v337_v10 }
   0xd   : > { %s137_s11 = scalar_select %p136_p3, %s361_s10, 2 }
   0xe   : > { %284 = sst [smem:[#allocation2]] (%p291_p4), %s338_s20  ;;  %p315_p8 = pneg %p314_p7 }
   0xf   : > { %s270_s12 = sshll.u32 %s137_s11, 3  ;;  %s197_s21 = sld [smem:[#allocation2]] }
  0x10   : > { %s139_s15 = scalar_lea.vmem %s404_s0, %s270_s12  ;;  %s143_s18 = scalar_lea.vmem %s405_s1, %s270_s12 }
  0x11   : > { %v150_v1 = vld [vmem:[%s139_s15] sm:$0xff]  ;;  %p320_p10 = pnand %p318_p9, %p315_p8 }
  0x12   : > { %v161_v2 = vsel %vm160_vm0, %v150_v1, -inf  ;;  %v151_v3 = vld [vmem:[%s143_s18] sm:$0xff] }
  0x13   : > { %162 = vmax.xlane.f32.xlu0 %v161_v2 }
  0x29   : > { %155 = vperm.xlu0 %307, %v151_v3  }
  0xa0   : > { %v163_v4 = vpop.xlane.xlu0 %162 }
  0xa1   : > { %v164_v5 = vsub.f32 %v150_v1, %v163_v4 }
  0xa3   : > { %v165_v7 = vmul.f32 1.442695, %v164_v5 }
  0xa5   : > { %308 = vpow2.f32 %v165_v7 }
  0xa8   : > { %v156_v9 = vpop.permute.xlu0 %155 }
  0xa9   : > { %vm157_vm1 = vcmp.eq.s32.totalorder %v153_v8, %v156_v9 }
  0xaa   : > { %v273_v11 = vsel %vm157_vm1, 1.0, %v337_v10 }
  0xaf   : > { %v309_v12 = vpop.eup %308 }
  0xb0   : > { %v167_v13 = vsel %vm160_vm0, %v309_v12, 0.0  ;;  %v170_v14 = vmul.f32 %v309_v12, %v273_v11 }
  0xb1   : > { %168 = vadd.xlane.f32.xlu1 %v167_v13 }
  0xb2   : > { %v171_v15 = vsel %vm160_vm0, %v170_v14, 0.0 }
  0xb5   : > { %172 = vadd.xlane.f32.xlu1 %v171_v15 }
 0x13e   : > { %v169_v20 = vpop.xlane.xlu1 %168 }
 0x13f   : > { %310 = vrcp.f32 %v169_v20 }
 0x142   : > { %v173_v22 = vpop.xlane.xlu1 %172 }
 0x149   : > { %v311_v21 = vpop.eup %310 }
 0x14a   : > { %v175_v23 = vmul.f32 %v311_v21, %v173_v22 }
 0x14c   : > { %v184_v24 = vsub.f32 1.0, %v175_v23 }
 0x14e   : > { %v185_v25 = vmul.f32 %v275_v19, %v184_v24 }
 0x150   : > { %v187_v26 = vsel %vm186_vm3, %v185_v25, 0.0 }
 0x151   : > { %188 = vadd.xlane.f32.xlu1 %v187_v26 }
 0x1de   : > { %v189_v27 = vpop.xlane.xlu1 %188 }
 0x1df   : > { %v190_v28 = vrot.slane %v189_v27, 4 }
 0x1e1   : > { %v191_v29 = vadd.f32 %v190_v28, %v189_v27 }
 0x1e3   : > { %v192_v30 = vrot.slane %v191_v29, 2 }
 0x1e5   : > { %v193_v31 = vadd.f32 %v192_v30, %v191_v29 }
 0x1e7   : > { %v194_v32 = vrot.slane %v193_v31, 1 }
 0x1e9   : > { %v195_v33 = vadd.f32 %v194_v32, %v193_v31 }
 0x1eb   : > { %281 = vpush %v195_v33 }
 0x21c   : > { %s282_s22 = spop %281 }
 0x21d   : > { %s198_s23 = sadd.f32 %s282_s22, %s197_s21 }
 0x21f   : > { %200 = sst [smem:[#allocation2]] %s198_s23  ;;  %s206_s24 = smul.f32 0.05, %s198_s23 }
 0x221   : > { %286 = sst [smem:[#allocation3]] (%p292_p5), %s206_s24 }
 0x222   : > { %323 = shalt.err (!%p320_p10)
}
 0x223   : > { %s339_s4 = smov [#allocation3]  }
 0x224   : > { %288 = dma.smem_to_hbm (%p292_p5), %s339_s4, 16, %s406_s2, [#allocation4]  }
 0x225   : > { %329 = dma.done.wait (%p292_p5), [#allocation4], 16  }
 0x226   : > { %331 = vsyncadd (%p292_p5), [#allocation4], 4294967280 }
 0x227   : > { %222 = sfence }
 0x228 PF: > { %s13_s9 = sadd.s32 1, %s334_s9  }
 0x229   : > { %p10_p11 = scmp.ge.s32.totalorder %s13_s9, 5  }
 0x22b   :  { %12 = sbr.rel (!%p10_p11) target bundleno = 1 (0x1), region = 69 }
 0x232   :  { %228 = vsyncpa [#allocation4], 1 }
 0x233   :  { %230 = vsyncpa [#allocation4 + $0x1], 1 }

</bundles_post_ra>
